<compile_context>
chip_gen: v5e
topology: v5e:2x2
jax: 0.10.0
libtpu: 0.0.40
codegen_flags: <defaults>
</compile_context>

<pallas_src>
import jax
import jax.numpy as jnp
from jax.experimental import pallas as pl
from jax.experimental.pallas import tpu as pltpu


def actor_kernel(state_ref, w1_ref, b1_ref, w2f_ref, b2_ref, out_ref):
    # h1 = l1(state): (TB, H) f32 MXU matmul + bias.
    h1 = jnp.dot(state_ref[...], w1_ref[...],
                 preferred_element_type=jnp.float32) + b1_ref[...]
    # r = relu(h1); relu(-h1) = r - h1 (exact: saves a VPU negate + max).
    r = jnp.maximum(h1, 0.0)
    n = r - h1
    # Lane-concat of two 128-wide vregs -> (TB, 2H); single K=256 MXU push
    # against the pre-stacked folded weight slab (one pass on v6e/v7x MXU).
    rn = jnp.concatenate([r, n], axis=-1)
    acc = jnp.dot(rn, w2f_ref[...], preferred_element_type=jnp.float32)
    # Bias + final ReLU. Output last dim is padded to 128 lanes -> unmasked vst.
    out_ref[...] = jnp.maximum(acc + b2_ref[...], 0.0)


def fold_actor_params(w1, b1, w2, b2, legal_actions, lane_pad=128):
    """One-time parameter preprocessing (keep OUTSIDE the per-call hot path).

    Folds the nested-CReLU structure of w2 into a single (2H, NP) slab, pre-
    selects the legal-action columns (gather with identical index rows is a
    pure column take), and zero-pads the column axis up to a multiple of 128
    lanes so every second-stage load/store is lane-dense.
    """
    hidden = w1.shape[1]
    wp = w2[0 * hidden:1 * hidden] + w2[2 * hidden:3 * hidden]   # multiplies relu(h1)
    wn = w2[1 * hidden:2 * hidden] + w2[5 * hidden:6 * hidden]   # multiplies relu(-h1)
    # w2[3H:5H] multiplies always-zero activations -> dropped (never DMA'd).
    wp = wp[:, legal_actions]
    wn = wn[:, legal_actions]
    b2s = b2[:, legal_actions]

    num_legal = int(legal_actions.shape[0])
    np_cols = max(lane_pad, ((num_legal + lane_pad - 1) // lane_pad) * lane_pad)
    pad = np_cols - num_legal
    wp = jnp.pad(wp, ((0, 0), (0, pad)))
    wn = jnp.pad(wn, ((0, 0), (0, pad)))
    b2p = jnp.pad(b2s, ((0, 0), (0, pad)))

    # Stack for a single fused K=2H matmul: [r | n] @ [wp ; wn].
    w2f = jnp.concatenate([wp, wn], axis=0)          # (2H, NP)
    return w1, b1, w2f, b2p


def actor_forward(state, w1, b1, w2f, b2p, *, block_b=512):
    """Gridded, pipelined hot path.

    Batch is tiled along a single "parallel" grid axis (v7x: both TensorCores
    take half the batch). Weights/bias use grid-invariant index_maps so they
    are DMA'd once and stay VMEM-resident across grid steps, while the
    state/output tiles are double-buffered by the Pallas pipeline.

    Returns the lane-padded (B, NP) output; slice [:, :num_legal] downstream
    (padded columns are exactly zero).
    """
    B, D = state.shape
    H = w1.shape[1]
    NP = w2f.shape[1]

    # Pick the largest power-of-two-friendly batch tile that divides B.
    if B % 8 == 0:
        TB = min(block_b, B)
        while B % TB != 0:
            TB //= 2
    else:
        TB = B            # single block; block_shape == full array dims is legal
    grid = (B // TB,)

    return pl.pallas_call(
        actor_kernel,
        out_shape=jax.ShapeDtypeStruct((B, NP), jnp.float32),
        grid=grid,
        in_specs=[
            pl.BlockSpec((TB, D), lambda i: (i, 0)),        # state: tiled over batch
            pl.BlockSpec((D, H), lambda i: (0, 0)),         # w1: grid-invariant
            pl.BlockSpec((1, H), lambda i: (0, 0)),         # b1: grid-invariant
            pl.BlockSpec((2 * H, NP), lambda i: (0, 0)),    # folded w2 slab
            pl.BlockSpec((1, NP), lambda i: (0, 0)),        # folded, padded b2
        ],
        out_specs=pl.BlockSpec((TB, NP), lambda i: (i, 0)),
        compiler_params=pltpu.CompilerParams(
            dimension_semantics=("parallel",)),
    )(state, w1, b1, w2f, b2p)


def init_actor_params(key, input_size, num_actions, hidden=128):
    """Deterministic init mirroring nn.Linear's U(-1/sqrt(fan_in), 1/sqrt(fan_in))."""
    k1, k2, k3, k4 = jax.random.split(key, 4)
    lim1 = 1.0 / jnp.sqrt(jnp.float32(input_size))
    lim2 = 1.0 / jnp.sqrt(jnp.float32(hidden * 6))
    w1 = jax.random.uniform(k1, (input_size, hidden), jnp.float32, -lim1, lim1)
    b1 = jax.random.uniform(k2, (1, hidden), jnp.float32, -lim1, lim1)
    w2 = jax.random.uniform(k3, (hidden * 6, num_actions), jnp.float32, -lim2, lim2)
    b2 = jax.random.uniform(k4, (1, num_actions), jnp.float32, -lim2, lim2)
    return w1, b1, w2, b2


def reference_forward(state, w1, b1, w2, b2, legal_actions):
    """Pure-JAX transcription of the original PyTorch forward (for validation)."""
    h1 = state @ w1 + b1
    crelu1 = jnp.maximum(jnp.concatenate([h1, -h1], axis=1), 0.0)
    h2 = jnp.concatenate([crelu1, h1], axis=1)
    h3 = jnp.maximum(jnp.concatenate([h2, -h2], axis=1), 0.0)
    h4 = h3 @ w2 + b2
    return jnp.take(jnp.maximum(h4, 0.0), legal_actions, axis=1)


if __name__ == "__main__":
    key = jax.random.PRNGKey(0)
    kp, kx = jax.random.split(key)

    batch = 256            # exercises the batch grid (TB=128 -> 2 grid steps)
    input_size = 32
    hidden = 128           # default from the module
    num_actions = 16

    w1, b1, w2, b2 = init_actor_params(kp, input_size, num_actions, hidden)
    state = jax.random.normal(kx, (batch, input_size), jnp.float32)
    # torch.gather index rows are identical for every batch element.
    legal_actions = jnp.array([0, 3, 5, 7, 9, 12], dtype=jnp.int32)
    num_legal = int(legal_actions.shape[0])

    # One-time parameter folding / column pre-select / 128-lane padding.
    w1_p, b1_p, w2f, b2p = fold_actor_params(w1, b1, w2, b2, legal_actions)

    out_padded = actor_forward(state, w1_p, b1_p, w2f, b2p, block_b=128)
    jax.block_until_ready(out_padded)
    out = out_padded[:, :num_legal]          # drop zero padding lanes

    ref = reference_forward(state, w1, b1, w2, b2, legal_actions)

    assert out_padded.shape == (batch, 128)
    assert out.shape == (batch, num_legal)
    assert bool(jnp.all(out_padded >= 0.0))                      # post-ReLU
    assert bool(jnp.all(out_padded[:, num_legal:] == 0.0))       # padding is zero
    assert bool(jnp.allclose(out, ref, rtol=1e-4, atol=1e-5))
    print("KERNEL_OK")
</pallas_src>

<mosaic_0001>
module attributes {stable_mosaic.version = 11 : i64} {
  func.func @actor_kernel(%arg0: i32, %arg1: memref<128x32xf32, #tpu.memory_space<vmem>>, %arg2: memref<32x128xf32, #tpu.memory_space<vmem>>, %arg3: memref<1x128xf32, #tpu.memory_space<vmem>>, %arg4: memref<256x128xf32, #tpu.memory_space<vmem>>, %arg5: memref<1x128xf32, #tpu.memory_space<vmem>>, %arg6: memref<128x128xf32, #tpu.memory_space<vmem>>) attributes {dimension_semantics = [#tpu.dimension_semantics<parallel>], iteration_bounds = array<i64: 2>, scalar_prefetch = 0 : i64, scratch_operands = 0 : i64, tpu.core_type = #tpu.core_type<tc>, window_params = [{transform_indices = @transform_0, window_bounds = array<i64: 128, 32>}, {pipeline_mode = #tpu.pipeline_mode<synchronous>, transform_indices = @transform_1, window_bounds = array<i64: 32, 128>}, {pipeline_mode = #tpu.pipeline_mode<synchronous>, transform_indices = @transform_2, window_bounds = array<i64: 1, 128>}, {pipeline_mode = #tpu.pipeline_mode<synchronous>, transform_indices = @transform_3, window_bounds = array<i64: 256, 128>}, {pipeline_mode = #tpu.pipeline_mode<synchronous>, transform_indices = @transform_4, window_bounds = array<i64: 1, 128>}, {transform_indices = @transform_5, window_bounds = array<i64: 128, 128>}]} {
    %c0 = arith.constant 0 : index
    %c0_0 = arith.constant 0 : index
    %0 = vector.load %arg1[%c0, %c0_0] : memref<128x32xf32, #tpu.memory_space<vmem>>, vector<128x32xf32>
    %c0_1 = arith.constant 0 : index
    %c0_2 = arith.constant 0 : index
    %1 = vector.load %arg2[%c0_1, %c0_2] : memref<32x128xf32, #tpu.memory_space<vmem>>, vector<32x128xf32>
    %cst = arith.constant dense<0.000000e+00> : vector<128x128xf32>
    %2 = tpu.matmul %0, %1, %cst {dimension_numbers = #tpu.dot_dimension_numbers<[1], [0], [0], [1], [0, 0, 1, 1], [], []>} : vector<128x32xf32>, vector<32x128xf32>, vector<128x128xf32> -> vector<128x128xf32>
    %c0_3 = arith.constant 0 : index
    %c0_4 = arith.constant 0 : index
    %3 = vector.load %arg3[%c0_3, %c0_4] : memref<1x128xf32, #tpu.memory_space<vmem>>, vector<1x128xf32>
    %4 = vector.broadcast %3 : vector<1x128xf32> to vector<128x128xf32>
    %5 = arith.addf %2, %4 : vector<128x128xf32>
    %cst_5 = arith.constant 0.000000e+00 : f32
    %6 = vector.broadcast %cst_5 : f32 to vector<128x128xf32>
    %7 = arith.maximumf %5, %6 : vector<128x128xf32>
    %8 = arith.subf %7, %5 : vector<128x128xf32>
    %9 = tpu.concatenate %7, %8 in 1 : vector<128x128xf32>, vector<128x128xf32> -> vector<128x256xf32>
    %c0_6 = arith.constant 0 : index
    %c0_7 = arith.constant 0 : index
    %10 = vector.load %arg4[%c0_6, %c0_7] : memref<256x128xf32, #tpu.memory_space<vmem>>, vector<256x128xf32>
    %cst_8 = arith.constant dense<0.000000e+00> : vector<128x128xf32>
    %11 = tpu.matmul %9, %10, %cst_8 {dimension_numbers = #tpu.dot_dimension_numbers<[1], [0], [0], [1], [0, 0, 1, 1], [], []>} : vector<128x256xf32>, vector<256x128xf32>, vector<128x128xf32> -> vector<128x128xf32>
    %c0_9 = arith.constant 0 : index
    %c0_10 = arith.constant 0 : index
    %12 = vector.load %arg5[%c0_9, %c0_10] : memref<1x128xf32, #tpu.memory_space<vmem>>, vector<1x128xf32>
    %13 = vector.broadcast %12 : vector<1x128xf32> to vector<128x128xf32>
    %14 = arith.addf %11, %13 : vector<128x128xf32>
    %cst_11 = arith.constant 0.000000e+00 : f32
    %15 = vector.broadcast %cst_11 : f32 to vector<128x128xf32>
    %16 = arith.maximumf %14, %15 : vector<128x128xf32>
    %c0_12 = arith.constant 0 : index
    %c0_13 = arith.constant 0 : index
    %17 = vector.load %arg6[%c0_12, %c0_13] : memref<128x128xf32, #tpu.memory_space<vmem>>, vector<128x128xf32>
    tpu.vector_store %arg6[%c0_12, %c0_13], %16 {strides = array<i32>} : memref<128x128xf32, #tpu.memory_space<vmem>>, vector<128x128xf32>,
    return
  }
  func.func @transform_0(%arg0: i32) -> (i32, i32) {
    %c0_i32 = arith.constant 0 : i32
    %c0_i32_0 = arith.constant 0 : i32
    return %arg0, %c0_i32 : i32, i32
  }
  func.func @transform_1(%arg0: i32) -> (i32, i32) {
    %c0_i32 = arith.constant 0 : i32
    %c0_i32_0 = arith.constant 0 : i32
    %c0_i32_1 = arith.constant 0 : i32
    return %c0_i32, %c0_i32_0 : i32, i32
  }
  func.func @transform_2(%arg0: i32) -> (i32, i32) {
    %c0_i32 = arith.constant 0 : i32
    %c0_i32_0 = arith.constant 0 : i32
    %c0_i32_1 = arith.constant 0 : i32
    return %c0_i32, %c0_i32_0 : i32, i32
  }
  func.func @transform_3(%arg0: i32) -> (i32, i32) {
    %c0_i32 = arith.constant 0 : i32
    %c0_i32_0 = arith.constant 0 : i32
    %c0_i32_1 = arith.constant 0 : i32
    return %c0_i32, %c0_i32_0 : i32, i32
  }
  func.func @transform_4(%arg0: i32) -> (i32, i32) {
    %c0_i32 = arith.constant 0 : i32
    %c0_i32_0 = arith.constant 0 : i32
    %c0_i32_1 = arith.constant 0 : i32
    return %c0_i32, %c0_i32_0 : i32, i32
  }
  func.func @transform_5(%arg0: i32) -> (i32, i32) {
    %c0_i32 = arith.constant 0 : i32
    %c0_i32_0 = arith.constant 0 : i32
    return %arg0, %c0_i32 : i32, i32
  }
}

</mosaic_0001>

<bundles_post_ra>
// kernel: tpu_custom_call.1
= control target key start
LH: loop header
LB: loop body
LE: loop exit
PB: predicated region body
PF: predicated region fallthrough
CT: control target
= control target key end

     0   :  { %10 = vsyncpa [#allocation3], 0  ;;  %s1187_s0 = inlined_call_operand.vmem [shape: f32[256,32], index: 0, kind: input, shape index: {}]   ;;  %s1188_s1 = inlined_call_operand.vmem [shape: f32[32,128], index: 1, kind: input, shape index: {}]   ;;  %s1189_s2 = inlined_call_operand.vmem [shape: f32[1,128], index: 2, kind: input, shape index: {}]   ;;  %s1190_s3 = inlined_call_operand.vmem [shape: f32[256,128], index: 3, kind: input, shape index: {}]   ;;  %s1191_s4 = inlined_call_operand.vmem [shape: f32[1,128], index: 4, kind: input, shape index: {}]   ;;  %s1192_s5 = inlined_call_operand.hbm [shape: f32[256,128], index: 5, kind: output, shape index: {}]  }
   0x1   :  { %12 = vsyncpa [#allocation3 + $0x1], 0  ;;  %s872_s18 = smov 0   ;;  %s874_s19 = smov 0  }
   0x2   :  { %s876_s20 = smov 0   ;;  %s878_s21 = smov 0  }
   0x3 LB: > { %s893_s22 = sadd.s32 4294967295, %s838_s21   ;;  %s672_s23 = sadd.s32 4294967294, %s838_s21   ;;  %s838_s21 = sphi %s878_s21, %s1198_s21   ;;  %s834_s20 = sphi %s876_s20, %s1197_s20   ;;  %s830_s19 = sphi %s874_s19, %s1196_s19   ;;  %s826_s18 = sphi %s872_s18, %s1195_s18  }
   0x4   : > { %s897_s24 = sadd.s32 1, %s838_s21   ;;  %s135_s25 = sadd.s32 1, %s834_s20 }
   0x5   : > { %s132_s26 = ssub.s32 %s838_s21, %s897_s24  ;;  %p145_p0 = scmp.ne.s32.totalorder %s834_s20, %s830_s19 }
   0x6   : > { %p133_p1 = scmp.eq.s32.totalorder %s132_s26, 0  ;;  %p146_p2 = scmp.eq.s32.totalorder %s893_s22, 1 }
   0x7   : > { %p151_p3 = scmp.ne.s32.totalorder %s830_s19, %s826_s18  ;;  %p152_p4 = scmp.eq.s32.totalorder %s672_s23, 1 }
   0x8   : > { %s908_s27 = scalar_select %p133_p1, %s834_s20, %s135_s25  }
   0x9   : > { %p910_p5 = por %p146_p2, %p145_p0  ;;  %p914_p6 = por %p152_p4, %p151_p3 }
   0xa   : > { %p675_p7 = scmp.ge.s32.totalorder %s838_s21, 1  ;;  %p191_p8 = scmp.lt.s32.totalorder %s838_s21, 3 }
   0xc   : > { %p192_p9 = pnand %p675_p7, %p191_p8 }
   0xd   : > { %s677_s9 = sshll.u32 (!%p192_p9), %s893_s22, 4  ;;  %s700_s12 = sshll.u32 (!%p192_p9), %s893_s22, 7 }
   0xe   : > { %195 = sbr.rel (%p192_p9) target bundleno = 449 (0x1c1), region = 40  ;;  %p220_p10 = scmp.lt.s32.totalorder (!%p192_p9), %s677_s9, 31 }
   0xf   : > { %s606_s15 = scalar_lea.hbm (!%p192_p9), %s1192_s5, %s700_s12  ;;  %s796_s7 = scalar_lea.hbm (!%p192_p9), %s1192_s5, 256 }
  0x10   : > { %s609_s23 = sshll.u32 (!%p192_p9), %s606_s15, 4  ;;  %s610_s23 = int_to_ptr.hbm [resolvable:$true] %s609_s23 }
  0x11   : > { %s790_s22 = sshra.s32 (!%p192_p9), %s610_s23, 4  ;;  %s791_s22 = int_to_ptr.hbm [resolvable:$true] %s790_s22 }
  0x12   : > { %s792_s26 = scalar_lea.hbm (!%p192_p9), %s791_s22, 128  ;;  %p797_p0 = scmp.lt.s32.totalorder (!%p192_p9), %s791_s22, %s1192_s5 }
  0x13   : > { %v245_v0 = vld [vmem:[%s1188_s1 + $0x18] sm:$0xff]  ;;  %v244_v1 = vld [vmem:[%s1188_s1 + $0x10] sm:$0xff]  ;;  %v243_v2 = vld [vmem:[%s1188_s1 + $0x8] sm:$0xff]  ;;  %s1200_s9 = smov (!%p220_p10, %s677_s9), 31  ;;  %vm250_vm0 = vcmask 261120   ;;  %p793_p11 = scmp.ne.s32.totalorder %s791_s22, %s792_s26 }
  0x14   : > { %311 = vmatpush.msra.mxu0 %v245_v0  ;;  %v242_v3 = vld [vmem:[%s1188_s1] sm:$0xff]  ;;  %s678_s14 = sshll.u32 %s1200_s9, 3  ;;  %v411_v13 = vld [vmem:[%s1190_s3 + $0x78] sm:$0xff]  ;;  %v410_v14 = vld [vmem:[%s1190_s3 + $0x70] sm:$0xff]  ;;  %s216_s9 = sand.u32 1, %s830_s19  }
  0x15   : > { %s936_s17 = scalar_lea.vmem %s1187_s0, %s678_s14  ;;  %v965_v15 = vld [vmem:[%s1190_s3 + $0xf8] sm:$0xff]  ;;  %432 = vmatpush.msra.mxu1 %v411_v13  ;;  %v971_v16 = vld [vmem:[%s1190_s3 + $0xf0] sm:$0xff]  ;;  %v409_v17 = vld [vmem:[%s1190_s3 + $0x68] sm:$0xff]  ;;  %701 = vmatpush.msra.mxu3 %v411_v13  ;;  %s676_s10 = sshll.u32 %s216_s9, 7 }
  0x16   : > { %312 = vmatpush.msra.mxu0 %v244_v1  ;;  %v226_v4 = vld [vmem:[%s936_s17] sm:$0xff]  ;;  %v227_v5 = vld [vmem:[%s936_s17 + $0x8] sm:$0xff]  ;;  %v228_v6 = vld [vmem:[%s936_s17 + $0x10] sm:$0xff]  ;;  %497 = vmatpush.msra.mxu2 %v965_v15  ;;  %s1120_s11 = scalar_lea.vmem [#allocation2], %s676_s10  ;;  %s595_s25 = scalar_lea.sflag [#allocation3], %s216_s9 }
  0x17   : > { %v229_v7 = vld [vmem:[%s936_s17 + $0x18] sm:$0xff]  ;;  %v230_v8 = vld [vmem:[%s936_s17 + $0x20] sm:$0xff]  ;;  %v231_v9 = vld [vmem:[%s936_s17 + $0x28] sm:$0xff]  ;;  %433 = vmatpush.msra.mxu1 %v410_v14  ;;  %702 = vmatpush.msra.mxu3 %v410_v14  ;;  %s607_s16 = sshll.u32 %s1120_s11, 4  ;;  %p794_p12 = pnand %p793_p11, %p910_p5  ;;  %s608_s16 = int_to_ptr.vmem [resolvable:$true] %s607_s16 }
  0x18   : > { %313 = vmatpush.msra.mxu0 %v243_v2  ;;  %v232_v10 = vld [vmem:[%s936_s17 + $0x30] sm:$0xff]  ;;  %v233_v11 = vld [vmem:[%s936_s17 + $0x38] sm:$0xff]  ;;  %v234_v12 = vld [vmem:[%s936_s17 + $0x40] sm:$0xff]  ;;  %498 = vmatpush.msra.mxu2 %v971_v16  ;;  %p798_p1 = scmp.lt.s32.totalorder %s796_s7, %s792_s26 }
  0x19   : > { %v235_v18 = vld [vmem:[%s936_s17 + $0x48] sm:$0xff]  ;;  %434 = vmatpush.msra.mxu1 %v409_v17  ;;  %703 = vmatpush.msra.mxu3 %v409_v17  ;;  %v408_v19 = vld [vmem:[%s1190_s3 + $0x60] sm:$0xff]  ;;  %v407_v21 = vld [vmem:[%s1190_s3 + $0x58] sm:$0xff]  ;;  %p795_p13 = pneg %p794_p12 }
  0x1a   : > { %314 = vmatpush.msra.mxu0 %v242_v3  ;;  %v985_v20 = vld [vmem:[%s1190_s3 + $0xe8] sm:$0xff]  ;;  %v994_v22 = vld [vmem:[%s1190_s3 + $0xe0] sm:$0xff]  ;;  %v406_v23 = vld [vmem:[%s1190_s3 + $0x50] sm:$0xff]  ;;  %p799_p2 = por %p798_p1, %p797_p0 }
  0x1b   : > { %679 = vmatmul.msk.f32.vlgmr.msra.gmra.mxu0 %vm250_vm0, %v226_v4  ;;  %435 = vmatpush.msra.mxu1 %v408_v19  ;;  %v1002_v24 = vld [vmem:[%s1190_s3 + $0xd8] sm:$0xff]  ;;  %v405_v25 = vld [vmem:[%s1190_s3 + $0x48] sm:$0xff]  ;;  %v1011_v26 = vld [vmem:[%s1190_s3 + $0xd0] sm:$0xff] }
  0x1c   : > { %499 = vmatpush.msra.mxu2 %v985_v20  ;;  %704 = vmatpush.msra.mxu3 %v408_v19  ;;  %v236_v27 = vld [vmem:[%s936_s17 + $0x50] sm:$0xff]  ;;  %v404_v28 = vld [vmem:[%s1190_s3 + $0x40] sm:$0xff]  ;;  %v421_v29 = vld [vmem:[%s1190_s3 + $0xc8] sm:$0xff]  ;;  %p800_p3 = pnand %p799_p2, %p795_p13 }
  0x1d   : > { %436 = vmatpush.msra.mxu1 %v407_v21  ;;  %v403_v30 = vld [vmem:[%s1190_s3 + $0x38] sm:$0xff]  ;;  %v420_v31 = vld [vmem:[%s1190_s3 + $0xc0] sm:$0xff]  ;;  %v402_v32 = vld [vmem:[%s1190_s3 + $0x30] sm:$0xff] }
  0x1e   : > { %500 = vmatpush.msra.mxu2 %v994_v22  ;;  %705 = vmatpush.msra.mxu3 %v407_v21  ;;  %v419_v33 = vld [vmem:[%s1190_s3 + $0xb8] sm:$0xff]  ;;  %v401_v34 = vld [vmem:[%s1190_s3 + $0x28] sm:$0xff]  ;;  %v418_v35 = vld [vmem:[%s1190_s3 + $0xb0] sm:$0xff] }
  0x1f   : > { %437 = vmatpush.msra.mxu1 %v406_v23  ;;  %v237_v36 = vld [vmem:[%s936_s17 + $0x58] sm:$0xff]  ;;  %v400_v37 = vld [vmem:[%s1190_s3 + $0x20] sm:$0xff]  ;;  %v417_v38 = vld [vmem:[%s1190_s3 + $0xa8] sm:$0xff] }
  0x20   : > { %501 = vmatpush.msra.mxu2 %v1002_v24  ;;  %706 = vmatpush.msra.mxu3 %v406_v23  ;;  %v399_v39 = vld [vmem:[%s1190_s3 + $0x18] sm:$0xff]  ;;  %v416_v40 = vld [vmem:[%s1190_s3 + $0xa0] sm:$0xff]  ;;  %v398_v41 = vld [vmem:[%s1190_s3 + $0x10] sm:$0xff] }
  0x21   : > { %438 = vmatpush.msra.mxu1 %v405_v25  ;;  %v415_v42 = vld [vmem:[%s1190_s3 + $0x98] sm:$0xff]  ;;  %v238_v43 = vld [vmem:[%s936_s17 + $0x60] sm:$0xff]  ;;  %v397_v44 = vld [vmem:[%s1190_s3 + $0x8] sm:$0xff] }
  0x22   : > { %502 = vmatpush.msra.mxu2 %v1011_v26  ;;  %707 = vmatpush.msra.mxu3 %v405_v25  ;;  %v414_v45 = vld [vmem:[%s1190_s3 + $0x90] sm:$0xff]  ;;  %v396_v46 = vld [vmem:[%s1190_s3] sm:$0xff]  ;;  %v413_v47 = vld [vmem:[%s1190_s3 + $0x88] sm:$0xff] }
  0x23   : > { %680 = vmatmul.msk.f32.gmra.mxu0 %vm250_vm0, %v227_v5  ;;  %439 = vmatpush.msra.mxu1 %v404_v28  ;;  %v412_v48 = vld [vmem:[%s1190_s3 + $0x80] sm:$0xff]  ;;  %v239_v49 = vld [vmem:[%s936_s17 + $0x68] sm:$0xff]  ;;  %v240_v50 = vld [vmem:[%s936_s17 + $0x70] sm:$0xff] }
  0x24   : > { %503 = vmatpush.msra.mxu2 %v421_v29  ;;  %708 = vmatpush.msra.mxu3 %v404_v28  ;;  %v241_v51 = vld [vmem:[%s936_s17 + $0x78] sm:$0xff]  ;;  %v1093_v52 = vld [vmem:[%s1189_s2] ss:$0 sm:$0xff] }
  0x25   : > { %440 = vmatpush.msra.mxu1 %v403_v30 }
  0x26   : > { %504 = vmatpush.msra.mxu2 %v420_v31  ;;  %709 = vmatpush.msra.mxu3 %v403_v30 }
  0x27   : > { %441 = vmatpush.msra.mxu1 %v402_v32 }
  0x28   : > { %505 = vmatpush.msra.mxu2 %v419_v33  ;;  %710 = vmatpush.msra.mxu3 %v402_v32 }
  0x29   : > { %442 = vmatpush.msra.mxu1 %v401_v34 }
  0x2a   : > { %506 = vmatpush.msra.mxu2 %v418_v35  ;;  %711 = vmatpush.msra.mxu3 %v401_v34 }
  0x2b   : > { %681 = vmatmul.msk.f32.gmra.mxu0 %vm250_vm0, %v228_v6  ;;  %443 = vmatpush.msra.mxu1 %v400_v37 }
  0x2c   : > { %507 = vmatpush.msra.mxu2 %v417_v38  ;;  %712 = vmatpush.msra.mxu3 %v400_v37 }
  0x2d   : > { %444 = vmatpush.msra.mxu1 %v399_v39 }
  0x2e   : > { %508 = vmatpush.msra.mxu2 %v416_v40  ;;  %713 = vmatpush.msra.mxu3 %v399_v39 }
  0x2f   : > { %445 = vmatpush.msra.mxu1 %v398_v41 }
  0x30   : > { %509 = vmatpush.msra.mxu2 %v415_v42  ;;  %714 = vmatpush.msra.mxu3 %v398_v41 }
  0x31   : > { %446 = vmatpush.msra.mxu1 %v397_v44 }
  0x32   : > { %510 = vmatpush.msra.mxu2 %v414_v45  ;;  %715 = vmatpush.msra.mxu3 %v397_v44 }
  0x33   : > { %682 = vmatmul.msk.f32.gmra.mxu0 %vm250_vm0, %v229_v7  ;;  %447 = vmatpush.msra.mxu1 %v396_v46 }
  0x34   : > { %511 = vmatpush.msra.mxu2 %v413_v47  ;;  %716 = vmatpush.msra.mxu3 %v396_v46 }
  0x36   : > { %512 = vmatpush.msra.mxu2 %v412_v48  ;;  %717 = vmatpush.msrb.mxu3 %v965_v15 }
  0x38   : > { %718 = vmatpush.msrb.mxu3 %v971_v16 }
  0x3a   : > { %719 = vmatpush.msrb.mxu3 %v985_v20 }
  0x3b   : > { %683 = vmatmul.msk.f32.gmra.mxu0 %vm250_vm0, %v230_v8 }
  0x3c   : > { %720 = vmatpush.msrb.mxu3 %v994_v22 }
  0x3e   : > { %721 = vmatpush.msrb.mxu3 %v1002_v24 }
  0x40   : > { %722 = vmatpush.msrb.mxu3 %v1011_v26 }
  0x42   : > { %723 = vmatpush.msrb.mxu3 %v421_v29 }
  0x43   : > { %684 = vmatmul.msk.f32.gmra.mxu0 %vm250_vm0, %v231_v9 }
  0x44   : > { %724 = vmatpush.msrb.mxu3 %v420_v31 }
  0x46   : > { %725 = vmatpush.msrb.mxu3 %v419_v33 }
  0x48   : > { %726 = vmatpush.msrb.mxu3 %v418_v35 }
  0x4a   : > { %727 = vmatpush.msrb.mxu3 %v417_v38 }
  0x4b   : > { %685 = vmatmul.msk.f32.gmra.mxu0 %vm250_vm0, %v232_v10 }
  0x4c   : > { %728 = vmatpush.msrb.mxu3 %v416_v40 }
  0x4e   : > { %729 = vmatpush.msrb.mxu3 %v415_v42 }
  0x50   : > { %730 = vmatpush.msrb.mxu3 %v414_v45 }
  0x52   : > { %731 = vmatpush.msrb.mxu3 %v413_v47 }
  0x53   : > { %686 = vmatmul.msk.f32.gmra.mxu0 %vm250_vm0, %v233_v11 }
  0x54   : > { %732 = vmatpush.msrb.mxu3 %v412_v48 }
  0x5b   : > { %687 = vmatmul.msk.f32.gmra.mxu0 %vm250_vm0, %v234_v12 }
  0x63   : > { %688 = vmatmul.msk.f32.gmra.mxu0 %vm250_vm0, %v235_v18 }
  0x6b   : > { %689 = vmatmul.msk.f32.gmra.mxu0 %vm250_vm0, %v236_v27 }
  0x73   : > { %690 = vmatmul.msk.f32.gmra.mxu0 %vm250_vm0, %v237_v36 }
  0x7b   : > { %691 = vmatmul.msk.f32.gmra.mxu0 %vm250_vm0, %v238_v43 }
  0x83   : > { %692 = vmatmul.msk.f32.gmra.mxu0 %vm250_vm0, %v239_v49 }
  0x8b   : > { %693 = vmatmul.msk.f32.gmra.mxu0 %vm250_vm0, %v240_v50 }
  0x93   : > { %694 = vmatmul.msk.f32.gmra.mxu0 %vm250_vm0, %v241_v51  ;;  %v1114_v51 = vld [vmem:[%s1191_s4] ss:$0 sm:$0xff] }
  0x98   : > { %v316_v53 = vpop.f32.mrf.mxu0 }
  0x99   : > { %v317_v54 = vadd.f32 %v1093_v52, %v316_v53 }
  0x9b   : > { %v364_v55 = vmax.f32 %v317_v54, 0.0 }
  0x9d   : > { %448 = vmatmul.f32.vlgmr.msra.gmra.mxu1 %v364_v55  ;;  %v380_v56 = vsub.f32 %v364_v55, %v317_v54 }
  0x9f   : > { %513 = vmatmul.f32.vlgmr.msra.gmra.mxu2 %v380_v56 }
  0xa0   : > { %v319_v57 = vpop.f32.mrf.mxu0 }
  0xa1   : > { %v320_v58 = vadd.f32 %v1093_v52, %v319_v57 }
  0xa3   : > { %v365_v59 = vmax.f32 %v320_v58, 0.0 }
  0xa5   : > { %451 = vmatmul.f32.gmra.mxu1 %v365_v59  ;;  %v381_v60 = vsub.f32 %v365_v59, %v320_v58 }
  0xa7   : > { %516 = vmatmul.f32.gmra.mxu2 %v381_v60 }
  0xa8   : > { %v322_v61 = vpop.f32.mrf.mxu0 }
  0xa9   : > { %v323_v62 = vadd.f32 %v1093_v52, %v322_v61 }
  0xab   : > { %v366_v63 = vmax.f32 %v323_v62, 0.0 }
  0xad   : > { %454 = vmatmul.f32.gmra.mxu1 %v366_v63  ;;  %v382_v0 = vsub.f32 %v366_v63, %v323_v62 }
  0xaf   : > { %519 = vmatmul.f32.gmra.mxu2 %v382_v0 }
  0xb0   : > { %v325_v1 = vpop.f32.mrf.mxu0 }
  0xb1   : > { %v326_v2 = vadd.f32 %v1093_v52, %v325_v1 }
  0xb3   : > { %v367_v3 = vmax.f32 %v326_v2, 0.0 }
  0xb5   : > { %457 = vmatmul.f32.gmra.mxu1 %v367_v3  ;;  %v383_v4 = vsub.f32 %v367_v3, %v326_v2 }
  0xb7   : > { %522 = vmatmul.f32.gmra.mxu2 %v383_v4 }
  0xb8   : > { %v328_v5 = vpop.f32.mrf.mxu0 }
  0xb9   : > { %v329_v6 = vadd.f32 %v1093_v52, %v328_v5 }
  0xbb   : > { %v368_v7 = vmax.f32 %v329_v6, 0.0 }
  0xbd   : > { %460 = vmatmul.f32.gmra.mxu1 %v368_v7  ;;  %v384_v8 = vsub.f32 %v368_v7, %v329_v6 }
  0xbf   : > { %525 = vmatmul.f32.gmra.mxu2 %v384_v8 }
  0xc0   : > { %v331_v9 = vpop.f32.mrf.mxu0 }
  0xc1   : > { %v332_v10 = vadd.f32 %v1093_v52, %v331_v9 }
  0xc3   : > { %v369_v11 = vmax.f32 %v332_v10, 0.0 }
  0xc5   : > { %463 = vmatmul.f32.gmra.mxu1 %v369_v11  ;;  %v385_v12 = vsub.f32 %v369_v11, %v332_v10 }
  0xc7   : > { %528 = vmatmul.f32.gmra.mxu2 %v385_v12 }
  0xc8   : > { %v334_v13 = vpop.f32.mrf.mxu0 }
  0xc9   : > { %v335_v14 = vadd.f32 %v1093_v52, %v334_v13 }
  0xcb   : > { %v370_v15 = vmax.f32 %v335_v14, 0.0 }
  0xcd   : > { %466 = vmatmul.f32.gmra.mxu1 %v370_v15  ;;  %v386_v16 = vsub.f32 %v370_v15, %v335_v14 }
  0xcf   : > { %531 = vmatmul.f32.gmra.mxu2 %v386_v16 }
  0xd0   : > { %v337_v17 = vpop.f32.mrf.mxu0 }
  0xd1   : > { %v338_v18 = vadd.f32 %v1093_v52, %v337_v17 }
  0xd3   : > { %v371_v19 = vmax.f32 %v338_v18, 0.0 }
  0xd5   : > { %469 = vmatmul.f32.gmra.mxu1 %v371_v19  ;;  %v387_v20 = vsub.f32 %v371_v19, %v338_v18 }
  0xd7   : > { %534 = vmatmul.f32.gmra.mxu2 %v387_v20 }
  0xd8   : > { %v340_v21 = vpop.f32.mrf.mxu0 }
  0xd9   : > { %v341_v22 = vadd.f32 %v1093_v52, %v340_v21 }
  0xdb   : > { %v372_v23 = vmax.f32 %v341_v22, 0.0 }
  0xdd   : > { %472 = vmatmul.f32.gmra.mxu1 %v372_v23  ;;  %v388_v24 = vsub.f32 %v372_v23, %v341_v22 }
  0xdf   : > { %537 = vmatmul.f32.gmra.mxu2 %v388_v24 }
  0xe0   : > { %v343_v25 = vpop.f32.mrf.mxu0 }
  0xe1   : > { %v344_v26 = vadd.f32 %v1093_v52, %v343_v25 }
  0xe3   : > { %v373_v27 = vmax.f32 %v344_v26, 0.0 }
  0xe5   : > { %475 = vmatmul.f32.gmra.mxu1 %v373_v27  ;;  %v389_v28 = vsub.f32 %v373_v27, %v344_v26 }
  0xe7   : > { %540 = vmatmul.f32.gmra.mxu2 %v389_v28 }
  0xe8   : > { %v346_v29 = vpop.f32.mrf.mxu0 }
  0xe9   : > { %v347_v30 = vadd.f32 %v1093_v52, %v346_v29 }
  0xeb   : > { %v374_v31 = vmax.f32 %v347_v30, 0.0 }
  0xed   : > { %478 = vmatmul.f32.gmra.mxu1 %v374_v31  ;;  %v390_v32 = vsub.f32 %v374_v31, %v347_v30 }
  0xef   : > { %543 = vmatmul.f32.gmra.mxu2 %v390_v32 }
  0xf0   : > { %v349_v33 = vpop.f32.mrf.mxu0 }
  0xf1   : > { %v350_v34 = vadd.f32 %v1093_v52, %v349_v33 }
  0xf3   : > { %v375_v35 = vmax.f32 %v350_v34, 0.0 }
  0xf5   : > { %481 = vmatmul.f32.gmra.mxu1 %v375_v35  ;;  %v391_v36 = vsub.f32 %v375_v35, %v350_v34 }
  0xf7   : > { %546 = vmatmul.f32.gmra.mxu2 %v391_v36 }
  0xf8   : > { %v352_v37 = vpop.f32.mrf.mxu0 }
  0xf9   : > { %v353_v38 = vadd.f32 %v1093_v52, %v352_v37 }
  0xfb   : > { %v376_v39 = vmax.f32 %v353_v38, 0.0 }
  0xfd   : > { %484 = vmatmul.f32.vlgmr.msra.gmra.mxu3 %v376_v39  ;;  %v392_v50 = vsub.f32 %v376_v39, %v353_v38 }
 0x100   : > { %v355_v40 = vpop.f32.mrf.mxu0 }
 0x101   : > { %v356_v41 = vadd.f32 %v1093_v52, %v355_v40 }
 0x103   : > { %v377_v42 = vmax.f32 %v356_v41, 0.0 }
 0x105   : > { %487 = vmatmul.f32.gmra.mxu3 %v377_v42  ;;  %v393_v57 = vsub.f32 %v377_v42, %v356_v41 }
 0x108   : > { %v358_v43 = vpop.f32.mrf.mxu0 }
 0x109   : > { %v359_v44 = vadd.f32 %v1093_v52, %v358_v43 }
 0x10b   : > { %v378_v45 = vmax.f32 %v359_v44, 0.0 }
 0x10d   : > { %490 = vmatmul.f32.gmra.mxu3 %v378_v45  ;;  %v394_v62 = vsub.f32 %v378_v45, %v359_v44 }
 0x110   : > { %v361_v46 = vpop.f32.mrf.mxu0 }
 0x111   : > { %v362_v47 = vadd.f32 %v1093_v52, %v361_v46 }
 0x113   : > { %v379_v48 = vmax.f32 %v362_v47, 0.0 }
 0x115   : > { %493 = vmatmul.f32.gmra.mxu3 %v379_v48  ;;  %v395_v4 = vsub.f32 %v379_v48, %v362_v47 }
 0x11a   : > { %v449_v49 = vpop.f32.mrf.mxu1 }
 0x11b   : > { %v450_v53 = vadd.f32 %v1114_v51, %v449_v49 }
 0x11d   : > { %549 = vmatmul.f32.vlgmr.msrb.gmra.mxu3 %v392_v50 }
 0x122   : > { %v452_v54 = vpop.f32.mrf.mxu1  ;;  %v514_v55 = vpop.f32.mrf.mxu2 }
 0x123   : > { %v515_v56 = vadd.f32 %v514_v55, %v450_v53  ;;  %v453_v58 = vadd.f32 %v1114_v51, %v452_v54 }
 0x125   : > { %v562_v52 = vmax.f32 %v515_v56, 0.0  ;;  %552 = vmatmul.f32.gmra.mxu3 %v393_v57 }
 0x127   : > { %578 = vst [vmem:[%s1120_s11] sm:$0xff] %v562_v52 }
 0x12a   : > { %v455_v59 = vpop.f32.mrf.mxu1  ;;  %v517_v60 = vpop.f32.mrf.mxu2 }
 0x12b   : > { %v518_v61 = vadd.f32 %v517_v60, %v453_v58  ;;  %v456_v0 = vadd.f32 %v1114_v51, %v455_v59 }
 0x12d   : > { %v563_v63 = vmax.f32 %v518_v61, 0.0  ;;  %555 = vmatmul.f32.gmra.mxu3 %v394_v62 }
 0x12f   : > { %579 = vst [vmem:[%s1120_s11 + $0x8] sm:$0xff] %v563_v63 }
 0x132   : > { %v458_v1 = vpop.f32.mrf.mxu1  ;;  %v520_v2 = vpop.f32.mrf.mxu2 }
 0x133   : > { %v521_v3 = vadd.f32 %v520_v2, %v456_v0  ;;  %v459_v6 = vadd.f32 %v1114_v51, %v458_v1 }
 0x135   : > { %v564_v5 = vmax.f32 %v521_v3, 0.0  ;;  %558 = vmatmul.f32.gmra.mxu3 %v395_v4 }
 0x137   : > { %580 = vst [vmem:[%s1120_s11 + $0x10] sm:$0xff] %v564_v5 }
 0x13a   : > { %v461_v7 = vpop.f32.mrf.mxu1  ;;  %v523_v8 = vpop.f32.mrf.mxu2 }
 0x13b   : > { %v524_v9 = vadd.f32 %v523_v8, %v459_v6  ;;  %v462_v11 = vadd.f32 %v1114_v51, %v461_v7 }
 0x13d   : > { %v565_v10 = vmax.f32 %v524_v9, 0.0 }
 0x13f   : > { %581 = vst [vmem:[%s1120_s11 + $0x18] sm:$0xff] %v565_v10 }
 0x142   : > { %v464_v12 = vpop.f32.mrf.mxu1  ;;  %v526_v13 = vpop.f32.mrf.mxu2 }
 0x143   : > { %v527_v14 = vadd.f32 %v526_v13, %v462_v11  ;;  %v465_v16 = vadd.f32 %v1114_v51, %v464_v12 }
 0x145   : > { %v566_v15 = vmax.f32 %v527_v14, 0.0 }
 0x147   : > { %582 = vst [vmem:[%s1120_s11 + $0x20] sm:$0xff] %v566_v15 }
 0x14a   : > { %v467_v17 = vpop.f32.mrf.mxu1  ;;  %v529_v18 = vpop.f32.mrf.mxu2 }
 0x14b   : > { %v530_v19 = vadd.f32 %v529_v18, %v465_v16  ;;  %v468_v21 = vadd.f32 %v1114_v51, %v467_v17 }
 0x14d   : > { %v567_v20 = vmax.f32 %v530_v19, 0.0 }
 0x14f   : > { %583 = vst [vmem:[%s1120_s11 + $0x28] sm:$0xff] %v567_v20 }
 0x152   : > { %v470_v22 = vpop.f32.mrf.mxu1  ;;  %v532_v23 = vpop.f32.mrf.mxu2 }
 0x153   : > { %v533_v24 = vadd.f32 %v532_v23, %v468_v21  ;;  %v471_v26 = vadd.f32 %v1114_v51, %v470_v22 }
 0x155   : > { %v568_v25 = vmax.f32 %v533_v24, 0.0 }
 0x157   : > { %584 = vst [vmem:[%s1120_s11 + $0x30] sm:$0xff] %v568_v25 }
 0x15a   : > { %v473_v27 = vpop.f32.mrf.mxu1  ;;  %v535_v28 = vpop.f32.mrf.mxu2 }
 0x15b   : > { %v536_v29 = vadd.f32 %v535_v28, %v471_v26  ;;  %v474_v31 = vadd.f32 %v1114_v51, %v473_v27 }
 0x15d   : > { %v569_v30 = vmax.f32 %v536_v29, 0.0 }
 0x15f   : > { %585 = vst [vmem:[%s1120_s11 + $0x38] sm:$0xff] %v569_v30 }
 0x162   : > { %v476_v32 = vpop.f32.mrf.mxu1  ;;  %v538_v33 = vpop.f32.mrf.mxu2 }
 0x163   : > { %v539_v34 = vadd.f32 %v538_v33, %v474_v31  ;;  %v477_v36 = vadd.f32 %v1114_v51, %v476_v32 }
 0x165   : > { %v570_v35 = vmax.f32 %v539_v34, 0.0 }
 0x167   : > { %586 = vst [vmem:[%s1120_s11 + $0x40] sm:$0xff] %v570_v35 }
 0x16a   : > { %v541_v37 = vpop.f32.mrf.mxu2  ;;  %v479_v39 = vpop.f32.mrf.mxu1 }
 0x16b   : > { %v542_v38 = vadd.f32 %v541_v37, %v477_v36  ;;  %v480_v41 = vadd.f32 %v1114_v51, %v479_v39 }
 0x16d   : > { %v571_v40 = vmax.f32 %v542_v38, 0.0 }
 0x16f   : > { %587 = vst [vmem:[%s1120_s11 + $0x48] sm:$0xff] %v571_v40 }
 0x172   : > { %v544_v42 = vpop.f32.mrf.mxu2  ;;  %v482_v45 = vpop.f32.mrf.mxu1 }
 0x173   : > { %v545_v43 = vadd.f32 %v544_v42, %v480_v41  ;;  %v483_v46 = vadd.f32 %v1114_v51, %v482_v45 }
 0x175   : > { %v572_v44 = vmax.f32 %v545_v43, 0.0 }
 0x177   : > { %588 = vst [vmem:[%s1120_s11 + $0x50] sm:$0xff] %v572_v44 }
 0x17a   : > { %v547_v47 = vpop.f32.mrf.mxu2 }
 0x17b   : > { %v548_v48 = vadd.f32 %v547_v47, %v483_v46 }
 0x17d   : > { %v573_v49 = vmax.f32 %v548_v48, 0.0 }
 0x17f   : > { %589 = vst [vmem:[%s1120_s11 + $0x58] sm:$0xff] %v573_v49 }
 0x180   : > { %v485_v50 = vpop.f32.mrf.mxu3 }
 0x181   : > { %v486_v56 = vadd.f32 %v1114_v51, %v485_v50 }
 0x188   : > { %v488_v53 = vpop.f32.mrf.mxu3 }
 0x189   : > { %v489_v59 = vadd.f32 %v1114_v51, %v488_v53 }
 0x190   : > { %v491_v54 = vpop.f32.mrf.mxu3 }
 0x191   : > { %v492_v63 = vadd.f32 %v1114_v51, %v491_v54 }
 0x198   : > { %v494_v55 = vpop.f32.mrf.mxu3 }
 0x199   : > { %v495_v3 = vadd.f32 %v1114_v51, %v494_v55 }
 0x1a0   : > { %v550_v57 = vpop.f32.mrf.mxu3 }
 0x1a1   : > { %v551_v52 = vadd.f32 %v550_v57, %v486_v56 }
 0x1a3   : > { %v574_v58 = vmax.f32 %v551_v52, 0.0 }
 0x1a5   : > { %590 = vst [vmem:[%s1120_s11 + $0x60] sm:$0xff] %v574_v58 }
 0x1a8   : > { %v553_v60 = vpop.f32.mrf.mxu3 }
 0x1a9   : > { %v554_v61 = vadd.f32 %v553_v60, %v489_v59 }
 0x1ab   : > { %v575_v62 = vmax.f32 %v554_v61, 0.0 }
 0x1ad   : > { %591 = vst [vmem:[%s1120_s11 + $0x68] sm:$0xff] %v575_v62 }
 0x1b0   : > { %v556_v0 = vpop.f32.mrf.mxu3 }
 0x1b1   : > { %v557_v1 = vadd.f32 %v556_v0, %v492_v63 }
 0x1b3   : > { %v576_v2 = vmax.f32 %v557_v1, 0.0 }
 0x1b5   : > { %592 = vst [vmem:[%s1120_s11 + $0x70] sm:$0xff] %v576_v2 }
 0x1b8   : > { %v559_v4 = vpop.f32.mrf.mxu3 }
 0x1b9   : > { %v560_v5 = vadd.f32 %v559_v4, %v495_v3 }
 0x1bb   : > { %v577_v6 = vmax.f32 %v560_v5, 0.0 }
 0x1bd   : > { %593 = vst [vmem:[%s1120_s11 + $0x78] sm:$0xff] %v577_v6 }
 0x1be   : > { %803 = shalt.err (!%p800_p3)
}
 0x1bf   : > { %s840_s9 = smov 128   ;;  %s841_s10 = smov 8  }
 0x1c0   : > { %733 = dma.vmem_to_hbm [thread:$0]  (%p910_p5), %s608_s16, 2048, %s610_s23, %s595_s25, %s840_s9, %s840_s9, %s841_s10  }
 0x1c1 PF: > { %p739_p4 = scmp.ge.s32.totalorder %s838_s21, 2  ;;  %s624_s11 = sand.u32 1, %s826_s18  }
 0x1c2   : > { %s625_s12 = scalar_lea.sflag [#allocation3], %s624_s11 }
 0x1c3   : > { %p736_p7 = pnand %p739_p4, %p914_p6 }
 0x1c5   : > { %p737_p8 = pneg %p736_p7 }
 0x1c7   : > { %821 = dma.done.wait (%p737_p8), %s625_s12, 2048  }
 0x1c8   : > { %823 = vsyncadd (%p737_p8), %s625_s12, 4294965248  ;;  %p15_p9 = scmp.ge.s32.totalorder %s897_s24, 4   ;;  %s1195_s18 = smov %s830_s19 }
 0x1c9   : > { %s1196_s19 = smov %s834_s20  ;;  %s1197_s20 = smov %s908_s27 }
 0x1ca   : > { %s1198_s21 = smov %s897_s24  ;;  %17 = sbr.rel (!%p15_p9) target bundleno = 3 (0x3), region = 75 }
 0x1cf   :  { %631 = vsyncpa [#allocation3], 1 }
 0x1d0   :  { %633 = vsyncpa [#allocation3 + $0x1], 1 }

</bundles_post_ra>
